<compile_context>
chip_gen: v7x
topology: tpu7x:2x2x1
jax: 0.10.0
libtpu: 0.0.40
codegen_flags: <defaults>
</compile_context>

<pallas_src>
import functools
import math

import jax
import jax.numpy as jnp
from jax.experimental import pallas as pl
from jax.experimental.pallas import tpu as pltpu

# HeavyPrompt.__init__ hardcodes inner_prune=0.1 in its super().__init__ call;
# cross_prune comes from FrontAndHead (0.1).
INNER_PRUNE = 0.1
CROSS_PRUNE = 0.1

# Classes padded to a full 128-lane vreg so the per-chunk probability store is
# an unmasked, lane-dense vst instead of a 2-wide masked partial store.
C_PAD = 128


def _front_and_head_kernel(tok_t_ref, top_base_ref, x_ref, adj_ref,
                           w1_ref, w2_ref, b2_ref,
                           probs_ref, cross_ref,
                           *, logit_cross, inv_m, mm_dtype):
    """One grid step = a chunk of G graphs (node rows arrive flattened)."""
    x2d = x_ref[...]                           # (G*N, D)  node features, flat rows
    ag = adj_ref[...]                          # (G, N, N) graph adjacency
    G, N, _ = ag.shape
    T = top_base_ref.shape[0]
    H = w1_ref.shape[1]

    # --- HeavyPrompt cross structure ------------------------------------------
    # One large MXU matmul (rows = G*N) instead of G tiny batched dots.
    # sigmoid(x @ tok.T) >= cross_prune  <=>  x @ tok.T >= logit(cross_prune);
    # sigmoid is monotone, so the threshold is folded at trace time (no EUP).
    # Threshold compare is kept in f32 so 0/1 adjacency bits never flip.
    cross_dot = jnp.dot(x2d, tok_t_ref[...],
                        preferred_element_type=jnp.float32)          # (G*N, T)
    cross_nt = (cross_dot >= logit_cross).astype(jnp.float32).reshape(G, N, T)
    # (token, node) layout: lane-dense store (N last) and the natural (M, K)
    # lhs layout for the h_top matmul; the wrapper no longer transposes.
    cross_tn = jnp.swapaxes(cross_nt, 1, 2)                          # (G, T, N)
    cross_ref[...] = cross_tn.astype(cross_ref.dtype)

    # --- GNN inference ---------------------------------------------------------
    # TODO(synk): `gnn` is an external argument of FrontAndHead.forward; we use
    # a deterministic stand-in single GCN layer (A + I) X W1 with leaky_relu.
    # Block-row form: token rows and node rows separately, so A_full / X_full
    # never need to be materialized (no concatenates, no eye).
    xw2d = jnp.dot(x2d.astype(mm_dtype), w1_ref[...].astype(mm_dtype),
                   preferred_element_type=jnp.float32)               # (G*N, H)
    xw_g = xw2d.reshape(G, N, H)
    # top_base = inner_adj @ (tok @ W1) + tok @ W1 is batch-invariant, hoisted
    # to the wrapper and passed in (computed once, not once per graph).
    h_top = top_base_ref[...][None] + jnp.einsum(
        'gtn,gnh->gth', cross_tn.astype(mm_dtype), xw_g.astype(mm_dtype),
        preferred_element_type=jnp.float32)                          # (G, T, H)
    h_bot = xw_g + jnp.einsum(
        'gnm,gmh->gnh', ag.astype(mm_dtype), xw_g.astype(mm_dtype),
        preferred_element_type=jnp.float32)                          # (G, N, H)
    h_top = jnp.where(h_top > 0, h_top, 0.01 * h_top)
    h_bot = jnp.where(h_bot > 0, h_bot, 0.01 * h_bot)

    # --- answering head: mean nodes -> Linear(hid, C) -> Softmax(dim=1) --------
    pooled = (jnp.sum(h_top, axis=1) + jnp.sum(h_bot, axis=1)) * inv_m  # (G, H)
    logits = jnp.dot(pooled, w2_ref[...],
                     preferred_element_type=jnp.float32) + b2_ref[...]  # (G, C_PAD)
    # Padded class columns carry a -1e30 bias -> exp underflows to 0, so the
    # softmax over real classes is exact.  Dense (G, 128) store, G % 8 == 0.
    probs_ref[...] = jax.nn.softmax(logits, axis=-1)


def _choose_grid(B, graphs_per_step, N, D, T, H, itemsize=4):
    """Pick graphs-per-step G and grid steps under a per-generation-safe VMEM budget."""
    def vmem_need(G):
        # double-buffered per-step inputs (x, adj) + outputs (cross, probs)
        dyn = 2 * itemsize * G * (N * D + N * N + T * N + C_PAD)
        # grid-invariant operands (also double-buffered by default)
        const = 2 * itemsize * (D * T + T * H + D * H + H * C_PAD + C_PAD)
        return dyn + const

    if graphs_per_step is None:
        G = pl.cdiv(B, 4)          # target ~4 grid steps
    else:
        G = max(1, graphs_per_step)
    G = max(8, ((G + 7) // 8) * 8)  # probs block (G, 128) needs G % 8 == 0
    budget = 24 * 1024 * 1024       # conservative: fits v7x's 64 MiB physical VMEM
    while G > 8 and vmem_need(G) > budget:
        G -= 8
    steps = max(2, pl.cdiv(B, G))   # >= 2 steps: DMA/compute overlap + megacore
    steps += steps % 2              # even split across v7x's two TensorCores
    return G, steps, vmem_need(G)


def front_and_head(tokens, x, adj, w1, w2, b2, *,
                   inner_prune=INNER_PRUNE, cross_prune=CROSS_PRUNE,
                   graphs_per_step=None, use_bf16_matmul=False):
    """Returns (probs (B, C), A_full (B, M, M), X_full (B, M, D))."""
    B, N, D = x.shape
    T = tokens.shape[0]
    M = T + N
    H = w1.shape[1]
    C = w2.shape[1]

    tokens = tokens.astype(jnp.float32)
    x = x.astype(jnp.float32)
    w1 = w1.astype(jnp.float32)
    # adj is pure 0/1 structure: keep the caller's dtype (bool/int8/f32) on the
    # kernel path and cast inside the kernel -> narrow adjacencies shrink DMA.

    # --- batch chunking: G graphs per grid step, >= 2 even steps ---------------
    G, steps, vmem_need = _choose_grid(B, graphs_per_step, N, D, T, H)
    B_pad = steps * G
    x_p, adj_p = x, adj
    if B_pad != B:
        x_p = jnp.pad(x, ((0, B_pad - B), (0, 0), (0, 0)))
        adj_p = jnp.pad(adj, ((0, B_pad - B), (0, 0), (0, 0)))
    # Rows of graph g stay contiguous, so a (G*N, D) row-block == G graphs.
    x2d = x_p.reshape(B_pad * N, D)

    # --- batch-invariant compute, hoisted out of the kernel --------------------
    logit_inner = math.log(inner_prune / (1.0 - inner_prune))
    logit_cross = math.log(cross_prune / (1.0 - cross_prune))
    inner_adj = (jnp.dot(tokens, tokens.T) >= logit_inner).astype(jnp.float32)  # (T,T)
    tok_xw = jnp.dot(tokens, w1)                                                 # (T,H)
    top_base = jnp.dot(inner_adj, tok_xw) + tok_xw                               # (T,H)
    tok_t = tokens.T                                                             # (D,T)

    # --- lane-dense answering head: pad classes to 128 lanes -------------------
    w2p = jnp.zeros((H, C_PAD), jnp.float32).at[:, :C].set(w2.astype(jnp.float32))
    b2p = jnp.full((1, C_PAD), -1e30, jnp.float32).at[:, :C].set(
        jnp.reshape(b2, (1, C)).astype(jnp.float32))

    mm_dtype = jnp.bfloat16 if use_bf16_matmul else jnp.float32
    kern = functools.partial(_front_and_head_kernel,
                             logit_cross=logit_cross, inv_m=1.0 / M,
                             mm_dtype=mm_dtype)

    out_shapes = (
        jax.ShapeDtypeStruct((B_pad, C_PAD), jnp.float32),   # probs (padded classes)
        jax.ShapeDtypeStruct((B_pad, T, N), jnp.bfloat16),   # cross adj, (T,N) layout
    )

    probs_pad, cross_tn = pl.pallas_call(
        kern,
        out_shape=out_shapes,
        grid_spec=pltpu.PrefetchScalarGridSpec(
            num_scalar_prefetch=0,
            grid=(steps,),
            in_specs=[
                pl.BlockSpec((D, T), lambda i: (0, 0)),          # tokens^T (shared)
                pl.BlockSpec((T, H), lambda i: (0, 0)),          # hoisted token rows
                pl.BlockSpec((G * N, D), lambda i: (i, 0)),      # node feats, flat rows
                pl.BlockSpec((G, N, N), lambda i: (i, 0, 0)),    # graph adjacency chunk
                pl.BlockSpec((D, H), lambda i: (0, 0)),          # gnn weight
                pl.BlockSpec((H, C_PAD), lambda i: (0, 0)),      # head weight (padded)
                pl.BlockSpec((1, C_PAD), lambda i: (0, 0)),      # head bias (padded)
            ],
            out_specs=[
                pl.BlockSpec((G, C_PAD), lambda i: (i, 0)),
                pl.BlockSpec((G, T, N), lambda i: (i, 0, 0)),
            ],
        ),
        compiler_params=pltpu.CompilerParams(
            # disjoint output blocks per step, no carried state -> truly parallel
            # (lets Mosaic shard the batch loop across v7x's two TensorCores).
            dimension_semantics=("parallel",),
            vmem_limit_bytes=max(vmem_need + (4 << 20), 32 << 20)),
    )(tok_t, top_base, x2d, adj_p, w1, w2p, b2p)

    probs = probs_pad[:B, :C]
    cross_adj = cross_tn[:B].astype(jnp.float32)               # (B, T, N), token-major

    # --- assemble prompted graph (dense analog of the edge_index lists) --------
    # Pure pass-through blocks (tokens, x, adj, zeros) are stitched by XLA here
    # instead of being routed through the kernel's DMA path.
    # TODO(synk): torch emits dynamic-length edge_index via nonzero(); dynamic
    # shapes have no Pallas equivalent, so we keep dense adjacency.
    adj_f = adj.astype(jnp.float32)
    a_full = jnp.concatenate([
        jnp.concatenate([jnp.broadcast_to(inner_adj, (B, T, T)), cross_adj], axis=2),
        jnp.concatenate([jnp.zeros((B, N, T), jnp.float32), adj_f], axis=2),
    ], axis=1)                                                  # (B, M, M)
    x_full = jnp.concatenate(
        [jnp.broadcast_to(tokens, (B, T, D)), x], axis=1)       # (B, M, D)

    return probs, a_full, x_full


def _reference(tokens, x, adj, w1, w2, b2):
    """Pure-JAX reference mirroring the kernel semantics (per-graph loop)."""
    B, N, _ = x.shape
    T = tokens.shape[0]
    outs, afs, xfs = [], [], []
    for b in range(B):
        xg, ag = x[b], adj[b]
        inner = (jax.nn.sigmoid(tokens @ tokens.T) >= INNER_PRUNE).astype(jnp.float32)
        cross = (jax.nn.sigmoid(tokens @ xg.T) >= CROSS_PRUNE).astype(jnp.float32)
        top = jnp.concatenate([inner, cross], axis=1)
        bot = jnp.concatenate([jnp.zeros((N, T), jnp.float32), ag], axis=1)
        A = jnp.concatenate([top, bot], axis=0)
        Xf = jnp.concatenate([tokens, xg], axis=0)
        h = (A + jnp.eye(T + N, dtype=jnp.float32)) @ (Xf @ w1)
        h = jnp.where(h > 0, h, 0.01 * h)
        pooled = h.mean(axis=0, keepdims=True)
        outs.append(jax.nn.softmax(pooled @ w2 + b2, axis=1))
        afs.append(A)
        xfs.append(Xf)
    return jnp.concatenate(outs, 0), jnp.stack(afs), jnp.stack(xfs)


if __name__ == "__main__":
    # Small shapes consistent with FrontAndHead(input_dim=32, hid_dim=16,
    # num_classes=2, token_num=10): batch of 4 graphs with 8 nodes each.
    # The default chunking pads the batch so the grid has 2 parallel steps.
    B, N, D, H, C, T = 4, 8, 32, 16, 2, 10

    key = jax.random.PRNGKey(0)
    k_tok, k_x, k_adj, k_w1, k_w2, k_b2 = jax.random.split(key, 6)

    # kaiming_uniform_(nonlinearity='leaky_relu', a=0.01, mode='fan_in')
    gain = math.sqrt(2.0 / (1.0 + 0.01 ** 2))
    bound = math.sqrt(3.0) * gain / math.sqrt(D)
    tokens = jax.random.uniform(k_tok, (T, D), jnp.float32, -bound, bound)

    x = jax.random.normal(k_x, (B, N, D), jnp.float32)
    adj = (jax.random.uniform(k_adj, (B, N, N)) < 0.3).astype(jnp.float32)

    w1 = jax.random.uniform(k_w1, (D, H), jnp.float32,
                            -1.0 / math.sqrt(D), 1.0 / math.sqrt(D))
    w2 = jax.random.uniform(k_w2, (H, C), jnp.float32,
                            -1.0 / math.sqrt(H), 1.0 / math.sqrt(H))
    b2 = jax.random.uniform(k_b2, (1, C), jnp.float32,
                            -1.0 / math.sqrt(H), 1.0 / math.sqrt(H))

    probs, a_full, x_full = front_and_head(tokens, x, adj, w1, w2, b2)
    jax.block_until_ready((probs, a_full, x_full))

    ref_probs, ref_a, ref_x = _reference(tokens, x, adj, w1, w2, b2)
    assert jnp.allclose(probs, ref_probs, rtol=1e-5, atol=1e-5), "probs mismatch"
    assert jnp.allclose(a_full, ref_a, rtol=1e-5, atol=1e-5), "adjacency mismatch"
    assert jnp.allclose(x_full, ref_x, rtol=1e-5, atol=1e-5), "features mismatch"

    print("KERNEL_OK")
</pallas_src>

<mosaic_0001>
module attributes {stable_mosaic.version = 11 : i64} {
  func.func @_front_and_head_kernel(%arg0: i32, %arg1: memref<32x10xf32, #tpu.memory_space<vmem>>, %arg2: memref<10x16xf32, #tpu.memory_space<vmem>>, %arg3: memref<64x32xf32, #tpu.memory_space<vmem>>, %arg4: memref<8x8x8xf32, #tpu.memory_space<vmem>>, %arg5: memref<32x16xf32, #tpu.memory_space<vmem>>, %arg6: memref<16x128xf32, #tpu.memory_space<vmem>>, %arg7: memref<1x128xf32, #tpu.memory_space<vmem>>, %arg8: memref<8x128xf32, #tpu.memory_space<vmem>>, %arg9: memref<8x10x8xbf16, #tpu.memory_space<vmem>>) attributes {dimension_semantics = [#tpu.dimension_semantics<parallel>], iteration_bounds = array<i64: 2>, scalar_prefetch = 0 : i64, scratch_operands = 0 : i64, tpu.core_type = #tpu.core_type<tc>, window_params = [{pipeline_mode = #tpu.pipeline_mode<synchronous>, transform_indices = @transform_0, window_bounds = array<i64: 32, 10>}, {pipeline_mode = #tpu.pipeline_mode<synchronous>, transform_indices = @transform_1, window_bounds = array<i64: 10, 16>}, {transform_indices = @transform_2, window_bounds = array<i64: 64, 32>}, {transform_indices = @transform_3, window_bounds = array<i64: 8, 8, 8>}, {pipeline_mode = #tpu.pipeline_mode<synchronous>, transform_indices = @transform_4, window_bounds = array<i64: 32, 16>}, {pipeline_mode = #tpu.pipeline_mode<synchronous>, transform_indices = @transform_5, window_bounds = array<i64: 16, 128>}, {pipeline_mode = #tpu.pipeline_mode<synchronous>, transform_indices = @transform_6, window_bounds = array<i64: 1, 128>}, {transform_indices = @transform_7, window_bounds = array<i64: 8, 128>}, {transform_indices = @transform_8, window_bounds = array<i64: 8, 10, 8>}]} {
    %c0 = arith.constant 0 : index
    %c0_0 = arith.constant 0 : index
    %0 = vector.load %arg3[%c0, %c0_0] : memref<64x32xf32, #tpu.memory_space<vmem>>, vector<64x32xf32>
    %c0_1 = arith.constant 0 : index
    %c0_2 = arith.constant 0 : index
    %c0_3 = arith.constant 0 : index
    %1 = vector.load %arg4[%c0_1, %c0_2, %c0_3] : memref<8x8x8xf32, #tpu.memory_space<vmem>>, vector<8x8x8xf32>
    %c0_4 = arith.constant 0 : index
    %c0_5 = arith.constant 0 : index
    %2 = vector.load %arg1[%c0_4, %c0_5] : memref<32x10xf32, #tpu.memory_space<vmem>>, vector<32x10xf32>
    %cst = arith.constant dense<0.000000e+00> : vector<64x10xf32>
    %3 = tpu.matmul %0, %2, %cst {dimension_numbers = #tpu.dot_dimension_numbers<[1], [0], [0], [1], [0, 0, 1, 1], [], []>} : vector<64x32xf32>, vector<32x10xf32>, vector<64x10xf32> -> vector<64x10xf32>
    %cst_6 = arith.constant -2.19722462 : f32
    %4 = vector.broadcast %cst_6 : f32 to vector<64x10xf32>
    %5 = arith.cmpf oge, %3, %4 : vector<64x10xf32>
    %6 = arith.extui %5 : vector<64x10xi1> to vector<64x10xi32>
    %7 = arith.sitofp %6 : vector<64x10xi32> to vector<64x10xf32>
    %8 = vector.shape_cast %7 : vector<64x10xf32> to vector<8x8x10xf32>
    %9 = tpu.transpose %8, [0, 2, 1] : vector<8x8x10xf32> -> vector<8x10x8xf32>
    %10 = arith.truncf %9 : vector<8x10x8xf32> to vector<8x10x8xbf16>
    %c0_7 = arith.constant 0 : index
    %c0_8 = arith.constant 0 : index
    %c0_9 = arith.constant 0 : index
    %11 = vector.load %arg9[%c0_7, %c0_8, %c0_9] : memref<8x10x8xbf16, #tpu.memory_space<vmem>>, vector<8x10x8xbf16>
    tpu.vector_store %arg9[%c0_7, %c0_8, %c0_9], %10 {strides = array<i32>} : memref<8x10x8xbf16, #tpu.memory_space<vmem>>, vector<8x10x8xbf16>,
    %c0_10 = arith.constant 0 : index
    %c0_11 = arith.constant 0 : index
    %12 = vector.load %arg5[%c0_10, %c0_11] : memref<32x16xf32, #tpu.memory_space<vmem>>, vector<32x16xf32>
    %cst_12 = arith.constant dense<0.000000e+00> : vector<64x16xf32>
    %13 = tpu.matmul %0, %12, %cst_12 {dimension_numbers = #tpu.dot_dimension_numbers<[1], [0], [0], [1], [0, 0, 1, 1], [], []>} : vector<64x32xf32>, vector<32x16xf32>, vector<64x16xf32> -> vector<64x16xf32>
    %14 = vector.shape_cast %13 : vector<64x16xf32> to vector<8x8x16xf32>
    %c0_13 = arith.constant 0 : index
    %c0_14 = arith.constant 0 : index
    %15 = vector.load %arg2[%c0_13, %c0_14] : memref<10x16xf32, #tpu.memory_space<vmem>>, vector<10x16xf32>
    %16 = vector.shape_cast %15 : vector<10x16xf32> to vector<1x10x16xf32>
    "tpu.trace_start"() <{level = 10 : i32, message = "gtn,gnh->gth"}> : () -> ()
    %cst_15 = arith.constant dense<0.000000e+00> : vector<8x10x16xf32>
    %17 = tpu.matmul %9, %14, %cst_15 {dimension_numbers = #tpu.dot_dimension_numbers<[2], [1], [1], [2], [0, 0, 0, 1, 1, 2], [0], [0]>} : vector<8x10x8xf32>, vector<8x8x16xf32>, vector<8x10x16xf32> -> vector<8x10x16xf32>
    "tpu.trace_stop"() : () -> ()
    %18 = vector.broadcast %16 : vector<1x10x16xf32> to vector<8x10x16xf32>
    %19 = arith.addf %18, %17 : vector<8x10x16xf32>
    "tpu.trace_start"() <{level = 10 : i32, message = "gnm,gmh->gnh"}> : () -> ()
    %cst_16 = arith.constant dense<0.000000e+00> : vector<8x8x16xf32>
    %20 = tpu.matmul %1, %14, %cst_16 {dimension_numbers = #tpu.dot_dimension_numbers<[2], [1], [1], [2], [0, 0, 0, 1, 1, 2], [0], [0]>} : vector<8x8x8xf32>, vector<8x8x16xf32>, vector<8x8x16xf32> -> vector<8x8x16xf32>
    "tpu.trace_stop"() : () -> ()
    %21 = arith.addf %14, %20 : vector<8x8x16xf32>
    %cst_17 = arith.constant 0.000000e+00 : f32
    %22 = vector.broadcast %cst_17 : f32 to vector<8x10x16xf32>
    %23 = arith.cmpf ogt, %19, %22 : vector<8x10x16xf32>
    %cst_18 = arith.constant 0.00999999977 : f32
    %24 = vector.broadcast %cst_18 : f32 to vector<8x10x16xf32>
    %25 = arith.mulf %24, %19 : vector<8x10x16xf32>
    %26 = arith.select %23, %19, %25 : vector<8x10x16xi1>, vector<8x10x16xf32>
    %cst_19 = arith.constant 0.000000e+00 : f32
    %27 = vector.broadcast %cst_19 : f32 to vector<8x8x16xf32>
    %28 = arith.cmpf ogt, %21, %27 : vector<8x8x16xf32>
    %cst_20 = arith.constant 0.00999999977 : f32
    %29 = vector.broadcast %cst_20 : f32 to vector<8x8x16xf32>
    %30 = arith.mulf %29, %21 : vector<8x8x16xf32>
    %31 = arith.select %28, %21, %30 : vector<8x8x16xi1>, vector<8x8x16xf32>
    %cst_21 = arith.constant dense<0.000000e+00> : vector<8x16xf32>
    %32 = vector.multi_reduction <add>, %26, %cst_21 [1] : vector<8x10x16xf32> to vector<8x16xf32>
    %cst_22 = arith.constant dense<0.000000e+00> : vector<8x16xf32>
    %33 = vector.multi_reduction <add>, %31, %cst_22 [1] : vector<8x8x16xf32> to vector<8x16xf32>
    %34 = arith.addf %32, %33 : vector<8x16xf32>
    %cst_23 = arith.constant 0.055555556 : f32
    %35 = vector.broadcast %cst_23 : f32 to vector<8x16xf32>
    %36 = arith.mulf %34, %35 : vector<8x16xf32>
    %c0_24 = arith.constant 0 : index
    %c0_25 = arith.constant 0 : index
    %37 = vector.load %arg6[%c0_24, %c0_25] : memref<16x128xf32, #tpu.memory_space<vmem>>, vector<16x128xf32>
    %cst_26 = arith.constant dense<0.000000e+00> : vector<8x128xf32>
    %38 = tpu.matmul %36, %37, %cst_26 {dimension_numbers = #tpu.dot_dimension_numbers<[1], [0], [0], [1], [0, 0, 1, 1], [], []>} : vector<8x16xf32>, vector<16x128xf32>, vector<8x128xf32> -> vector<8x128xf32>
    %c0_27 = arith.constant 0 : index
    %c0_28 = arith.constant 0 : index
    %39 = vector.load %arg7[%c0_27, %c0_28] : memref<1x128xf32, #tpu.memory_space<vmem>>, vector<1x128xf32>
    %40 = vector.broadcast %39 : vector<1x128xf32> to vector<8x128xf32>
    %41 = arith.addf %38, %40 : vector<8x128xf32>
    %cst_29 = arith.constant dense<0xFF800000> : vector<8xf32>
    %42 = vector.multi_reduction <maximumf>, %41, %cst_29 [1] : vector<8x128xf32> to vector<8xf32>
    %cst_30 = arith.constant 0xFF800000 : f32
    %43 = vector.broadcast %cst_30 : f32 to vector<8xf32>
    %44 = arith.maximumf %43, %42 : vector<8xf32>
    %45 = vector.shape_cast %44 : vector<8xf32> to vector<8x1xf32>
    %46 = vector.broadcast %45 : vector<8x1xf32> to vector<8x128xf32>
    %47 = arith.subf %41, %46 : vector<8x128xf32>
    %48 = math.exp %47 : vector<8x128xf32>
    %cst_31 = arith.constant dense<0.000000e+00> : vector<8xf32>
    %49 = vector.multi_reduction <add>, %48, %cst_31 [1] : vector<8x128xf32> to vector<8xf32>
    %50 = vector.shape_cast %49 : vector<8xf32> to vector<8x1xf32>
    %51 = vector.broadcast %50 : vector<8x1xf32> to vector<8x128xf32>
    %52 = arith.divf %48, %51 : vector<8x128xf32>
    %c0_32 = arith.constant 0 : index
    %c0_33 = arith.constant 0 : index
    %53 = vector.load %arg8[%c0_32, %c0_33] : memref<8x128xf32, #tpu.memory_space<vmem>>, vector<8x128xf32>
    tpu.vector_store %arg8[%c0_32, %c0_33], %52 {strides = array<i32>} : memref<8x128xf32, #tpu.memory_space<vmem>>, vector<8x128xf32>,
    return
  }
  func.func @transform_0(%arg0: i32) -> (i32, i32) {
    %c0_i32 = arith.constant 0 : i32
    %c0_i32_0 = arith.constant 0 : i32
    %c0_i32_1 = arith.constant 0 : i32
    return %c0_i32, %c0_i32_0 : i32, i32
  }
  func.func @transform_1(%arg0: i32) -> (i32, i32) {
    %c0_i32 = arith.constant 0 : i32
    %c0_i32_0 = arith.constant 0 : i32
    %c0_i32_1 = arith.constant 0 : i32
    return %c0_i32, %c0_i32_0 : i32, i32
  }
  func.func @transform_2(%arg0: i32) -> (i32, i32) {
    %c0_i32 = arith.constant 0 : i32
    %c0_i32_0 = arith.constant 0 : i32
    return %arg0, %c0_i32 : i32, i32
  }
  func.func @transform_3(%arg0: i32) -> (i32, i32, i32) {
    %c0_i32 = arith.constant 0 : i32
    %c0_i32_0 = arith.constant 0 : i32
    %c0_i32_1 = arith.constant 0 : i32
    return %arg0, %c0_i32, %c0_i32_0 : i32, i32, i32
  }
  func.func @transform_4(%arg0: i32) -> (i32, i32) {
    %c0_i32 = arith.constant 0 : i32
    %c0_i32_0 = arith.constant 0 : i32
    %c0_i32_1 = arith.constant 0 : i32
    return %c0_i32, %c0_i32_0 : i32, i32
  }
  func.func @transform_5(%arg0: i32) -> (i32, i32) {
    %c0_i32 = arith.constant 0 : i32
    %c0_i32_0 = arith.constant 0 : i32
    %c0_i32_1 = arith.constant 0 : i32
    return %c0_i32, %c0_i32_0 : i32, i32
  }
  func.func @transform_6(%arg0: i32) -> (i32, i32) {
    %c0_i32 = arith.constant 0 : i32
    %c0_i32_0 = arith.constant 0 : i32
    %c0_i32_1 = arith.constant 0 : i32
    return %c0_i32, %c0_i32_0 : i32, i32
  }
  func.func @transform_7(%arg0: i32) -> (i32, i32) {
    %c0_i32 = arith.constant 0 : i32
    %c0_i32_0 = arith.constant 0 : i32
    return %arg0, %c0_i32 : i32, i32
  }
  func.func @transform_8(%arg0: i32) -> (i32, i32, i32) {
    %c0_i32 = arith.constant 0 : i32
    %c0_i32_0 = arith.constant 0 : i32
    %c0_i32_1 = arith.constant 0 : i32
    return %arg0, %c0_i32, %c0_i32_0 : i32, i32, i32
  }
}

</mosaic_0001>

<bundles_post_ra>
// kernel: tpu_custom_call.1
= control target key start
LH: loop header
LB: loop body
LE: loop exit
PB: predicated region body
PF: predicated region fallthrough
CT: control target
= control target key end

     0   :  { %14 = vsyncpa [#allocation3], 0  ;;  %s3592_s0 = inlined_call_operand.vmem [shape: f32[32,10], index: 0, kind: input, shape index: {}]   ;;  %s3593_s1 = inlined_call_operand.vmem [shape: f32[10,16], index: 1, kind: input, shape index: {}]   ;;  %s3594_s2 = inlined_call_operand.vmem [shape: f32[128,32], index: 2, kind: input, shape index: {}]   ;;  %s3595_s3 = inlined_call_operand.vmem [shape: f32[16,8,8], index: 3, kind: input, shape index: {}]   ;;  %s3596_s4 = inlined_call_operand.vmem [shape: f32[32,16], index: 4, kind: input, shape index: {}]   ;;  %s3597_s5 = inlined_call_operand.vmem [shape: f32[16,128], index: 5, kind: input, shape index: {}]   ;;  %s3598_s6 = inlined_call_operand.vmem [shape: f32[1,128], index: 6, kind: input, shape index: {}]   ;;  %s3599_s7 = inlined_call_operand.hbm [shape: f32[16,128], index: 7, kind: output, shape index: {0}]   ;;  %s3600_s8 = inlined_call_operand.vmem [shape: bf16[16,10,8], index: 8, kind: output, shape index: {1}]  }
   0x1   :  { %16 = vsyncpa [#allocation3 + $0x1], 0  ;;  %s3195_s27 = smov 0   ;;  %s3197_s28 = smov 0  }
   0x2   :  { %s3199_s29 = smov 0   ;;  %s3201_s30 = smov 0  }
   0x3 LB: > { %s3216_s9 = sadd.s32 4294967295, %s3144_s30   ;;  %s2676_s10 = sadd.s32 4294967294, %s3144_s30   ;;  %s3144_s30 = sphi %s3201_s30, %s3606_s30   ;;  %s3140_s29 = sphi %s3199_s29, %s3605_s29   ;;  %s3136_s28 = sphi %s3197_s28, %s3604_s28   ;;  %s3132_s27 = sphi %s3195_s27, %s3603_s27  }
   0x4   : > { %s3220_s11 = sadd.s32 1, %s3144_s30   ;;  %s186_s12 = sadd.s32 1, %s3140_s29 }
   0x5   : > { %s183_s13 = ssub.s32 %s3144_s30, %s3220_s11  ;;  %p196_p0 = scmp.ne.s32.totalorder %s3140_s29, %s3136_s28 }
   0x6   : > { %p184_p1 = scmp.eq.s32.totalorder %s183_s13, 0  ;;  %p197_p2 = scmp.eq.s32.totalorder %s3216_s9, 1 }
   0x7   : > { %p202_p3 = scmp.ne.s32.totalorder %s3136_s28, %s3132_s27  ;;  %p203_p4 = scmp.eq.s32.totalorder %s2676_s10, 1 }
   0x8   : > { %s3231_s14 = scalar_select %p184_p1, %s3140_s29, %s186_s12  }
   0x9   : > { %p3233_p5 = por %p197_p2, %p196_p0  ;;  %p3237_p6 = por %p203_p4, %p202_p3 }
   0xa   : > { %p2679_p7 = scmp.ge.s32.totalorder %s3144_s30, 1  ;;  %p280_p8 = scmp.lt.s32.totalorder %s3144_s30, 3 }
   0xc   : > { %p281_p9 = pnand %p2679_p7, %p280_p8 }
   0xd   : > { %v360_v0 = vld [vmem:[%s3592_s0] sm:$0xff] (!%p281_p9)  ;;  %v361_v1 = vld [vmem:[%s3592_s0 + $0x8] sm:$0xff] (!%p281_p9)  ;;  %v362_v2 = vld [vmem:[%s3592_s0 + $0x10] sm:$0xff] (!%p281_p9)  ;;  %s2681_s23 = sshll.u32 (!%p281_p9), %s3216_s9, 3  ;;  %vm364_vm0 = vcmask (!%p281_p9), 261120   ;;  %v3146_v23 = vmov (!%p281_p9), 0.0  }
   0xe   : > { %284 = sbr.rel (%p281_p9) target bundleno = 1204 (0x4b4), region = 48  ;;  %v2969_v3 = vpack.c.bf16 (!%p281_p9), %v361_v1, %v360_v0  ;;  %v363_v4 = vld [vmem:[%s3592_s0 + $0x18] sm:$0xff] (!%p281_p9)  ;;  %p326_p10 = scmp.lt.s32.totalorder (!%p281_p9), %s2681_s23, 15  ;;  %v856_v5 = vld [vmem:[%s3596_s4] sm:$0xff] (!%p281_p9)  ;;  %v857_v6 = vld [vmem:[%s3596_s4 + $0x8] sm:$0xff] (!%p281_p9)  ;;  %vm967_vm9 = vcmask (!%p281_p9), 64512  }
   0xf   : > { %v2973_v7 = vpack.c.bf16 (!%p281_p9), %v363_v4, %v362_v2  ;;  %v2977_v8 = vpack.c.bf16 (!%p281_p9), %v857_v6, %v856_v5  ;;  %v858_v9 = vld [vmem:[%s3596_s4 + $0x10] sm:$0xff] (!%p281_p9)  ;;  %v859_v10 = vld [vmem:[%s3596_s4 + $0x18] sm:$0xff] (!%p281_p9)  ;;  %vm838_vm10 = vcmask (!%p281_p9), 60416   ;;  %vm840_vm11 = vcmask (!%p281_p9), 57344   ;;  %s314_s12 = sand.u32 (!%p281_p9), 1, %s3136_s28  }
  0x10   : > { %2970 = vmatprep.subr.bf16.mxu0 (!%p281_p9), %v2969_v3  ;;  %v2981_v11 = vpack.c.bf16 (!%p281_p9), %v859_v10, %v858_v9  ;;  %vm3147_vm12 = vmmov (!%p281_p9), 0   ;;  %vm2298_vm13 = vcmask (!%p281_p9), 123904   ;;  %vm2296_vm14 = vcmask (!%p281_p9), 130048   ;;  %s2680_s13 = sshll.u32 (!%p281_p9), %s314_s12, 3  ;;  %s2556_s24 = scalar_lea.sflag (!%p281_p9), [#allocation3], %s314_s12 }
  0x11   : > { %2972 = vmatpush3.bf16.msra.mxu0 (!%p281_p9), %v2969_v3  ;;  %2978 = vmatprep.subr.bf16.mxu1 (!%p281_p9), %v2977_v8  ;;  %s316_s18 = scalar_lea.vmem (!%p281_p9), [#allocation2], %s2680_s13 }
  0x12   : > { %2974 = vmatprep.subr.bf16.mxu0 (!%p281_p9), %v2973_v7  ;;  %2980 = vmatpush3.bf16.msra.mxu1 (!%p281_p9), %v2977_v8  ;;  %s2575_s19 = sshll.u32 (!%p281_p9), %s316_s18, 4  ;;  %s3552_s19 = int_to_ptr.vmem [resolvable:$true] %s2575_s19 }
  0x13   : > { %2982 = vmatprep.subr.bf16.mxu1 (!%p281_p9), %v2981_v11 }
  0x15   : > { %s3608_s23 = smov (!%p326_p10, %s2681_s23), 15  ;;  %2976 = vmatpush3.bf16.msra.mxu0 %v2973_v7 }
  0x16   : > { %s3268_s21 = sshll.u32 %s3608_s23, 3  ;;  %2984 = vmatpush3.bf16.msra.mxu1 %v2981_v11 }
  0x17   : > { %s329_s25 = scalar_lea.vmem %s3594_s2, %s3268_s21  ;;  %s3324_s10 = scalar_lea.vmem %s3600_s8, %s3268_s21 }
  0x18   : > { %v344_v12 = vld [vmem:[%s329_s25] sm:$0xff]  ;;  %v345_v13 = vld [vmem:[%s329_s25 + $0x8] sm:$0xff]  ;;  %v346_v14 = vld [vmem:[%s329_s25 + $0x10] sm:$0xff]  ;;  %s3376_s17 = scalar_lea.vmem %s3595_s3, %s3268_s21 }
  0x19   : > { %2850 = vmatprep.mubr.msk.f32.mxu0 %vm364_vm0, %v344_v12  ;;  %2870 = vmatprep.mubr.msk.f32.mxu1 %vm364_vm0, %v344_v12  ;;  %v347_v15 = vld [vmem:[%s329_s25 + $0x18] sm:$0xff]  ;;  %v348_v16 = vld [vmem:[%s329_s25 + $0x20] sm:$0xff]  ;;  %v349_v17 = vld [vmem:[%s329_s25 + $0x28] sm:$0xff] }
  0x1a   : > { %2851 = vmatmul.mubr.msk.f32.vlgmr.msra.gmra.mrb[0].mxu0 %vm364_vm0, %v345_v13  ;;  %2871 = vmatmul.mubr.msk.f32.vlgmr.msra.gmra.mrb[0].mxu1 %vm364_vm0, %v345_v13  ;;  %v350_v18 = vld [vmem:[%s329_s25 + $0x30] sm:$0xff]  ;;  %v351_v19 = vld [vmem:[%s329_s25 + $0x38] sm:$0xff]  ;;  %s3082_s25 = scalar_lea.vmem %s3552_s19, 128 }
  0x1b   : > { %2853 = vmatprep.mubr.msk.f32.mxu0 %vm364_vm0, %v346_v14  ;;  %2873 = vmatprep.mubr.msk.f32.mxu1 %vm364_vm0, %v346_v14  ;;  %p3083_p11 = scmp.ne.s32.totalorder %s3552_s19, %s3082_s25 }
  0x1d   : > { %p3084_p12 = pnand %p3083_p11, %p3233_p5 }
  0x1e   : > { %2854 = vmatmul.mubr.msk.f32.gmra.mrb[2].mxu0 %vm364_vm0, %v347_v15  ;;  %2874 = vmatmul.mubr.msk.f32.gmra.mrb[2].mxu1 %vm364_vm0, %v347_v15 }
  0x1f   : > { %2856 = vmatprep.mubr.msk.f32.mxu0 %vm364_vm0, %v348_v16  ;;  %2876 = vmatprep.mubr.msk.f32.mxu1 %vm364_vm0, %v348_v16  ;;  %p3085_p13 = pneg %p3084_p12 }
  0x22   : > { %2857 = vmatmul.mubr.msk.f32.gmra.mrb[4].mxu0 %vm364_vm0, %v349_v17  ;;  %2877 = vmatmul.mubr.msk.f32.gmra.mrb[4].mxu1 %vm364_vm0, %v349_v17 }
  0x23   : > { %2859 = vmatprep.mubr.msk.f32.mxu0 %vm364_vm0, %v350_v18  ;;  %2879 = vmatprep.mubr.msk.f32.mxu1 %vm364_vm0, %v350_v18 }
  0x26   : > { %2860 = vmatmul.mubr.msk.f32.gmra.mrb[6].mxu0 %vm364_vm0, %v351_v19  ;;  %2880 = vmatmul.mubr.msk.f32.gmra.mrb[6].mxu1 %vm364_vm0, %v351_v19 }
  0xed   : > { %v2852_v20 = vpop.f32.mrb[0].mxu0  ;;  %v3290_v22 = vpop.f32.mrb[0].mxu1 }
  0xee   : > { %vm495_vm1 = vcmp.ge.f32.partialorder %v2852_v20, -2.1972246  ;;  %v455_v21 = vpop.f32.mrb[1].mxu0  ;;  %v3293_v25 = vpop.f32.mrb[1].mxu1  ;;  %2887 = vmatprep.subr.mxu1 %v3290_v22 }
  0xef   : > { %vm494_vm2 = vcmp.ge.f32.partialorder %v455_v21, -2.1972246  ;;  %v2697_v24 = vsel %vm495_vm1, 1.0, %v3146_v23  ;;  %2882 = vmatprep.subr.mxu0 %v3293_v25  ;;  %2888 = vmatpush3.msra.mxu1 %v3290_v22 }
  0xf0   : > { %v2696_v26 = vsel %vm494_vm2, 1.0, %v3146_v23  ;;  %2883 = vmatpush3.msra.mxu0 %v3293_v25 }
  0xf1   : > { %v2855_v27 = vpop.f32.mrb[2].mxu0  ;;  %v3030_v28 = vpack.i.bf16 %v2697_v24, %v2696_v26  ;;  %v3306_v42 = vpop.f32.mrb[2].mxu1 }
  0xf2   : > { %vm497_vm3 = vcmp.ge.f32.partialorder %v2855_v27, -2.1972246  ;;  %v465_v29 = vpop.f32.mrb[3].mxu0  ;;  %v3308_v44 = vpop.f32.mrb[3].mxu1  ;;  %2897 = vmatprep.subr.mxu1 %v3306_v42 }
  0xf3   : > { %v2699_v30 = vsel %vm497_vm3, 1.0, %v3146_v23  ;;  %vm496_vm4 = vcmp.ge.f32.partialorder %v465_v29, -2.1972246  ;;  %3031 = vxpose.xlu0.b32.start.end [1/1] (short) (narrow) %v3030_v28, 16  ;;  %2892 = vmatprep.subr.mxu0 %v3308_v44  ;;  %v352_v28 = vld [vmem:[%s3376_s17] sm:$0xff]  ;;  %v353_v29 = vld [vmem:[%s3376_s17 + $0x8] sm:$0xff] }
  0xf4   : > { %v2698_v31 = vsel %vm496_vm4, 1.0, %v3146_v23 }
  0xf5   : > { %v2858_v32 = vpop.f32.mrb[4].mxu0  ;;  %v3042_v33 = vpack.i.bf16 %v2699_v30, %v2698_v31  ;;  %v3312_v45 = vpop.f32.mrb[4].mxu1  ;;  %v354_v30 = vld [vmem:[%s3376_s17 + $0x10] sm:$0xff]  ;;  %v355_v31 = vld [vmem:[%s3376_s17 + $0x18] sm:$0xff] }
  0xf6   : > { %vm499_vm5 = vcmp.ge.f32.partialorder %v2858_v32, -2.1972246  ;;  %v475_v34 = vpop.f32.mrb[5].mxu0  ;;  %v3314_v46 = vpop.f32.mrb[5].mxu1  ;;  %v356_v32 = vld [vmem:[%s3376_s17 + $0x20] sm:$0xff] }
  0xf7   : > { %vm498_vm6 = vcmp.ge.f32.partialorder %v475_v34, -2.1972246  ;;  %v2701_v35 = vsel %vm499_vm5, 1.0, %v3146_v23  ;;  %v358_v34 = vld [vmem:[%s3376_s17 + $0x30] sm:$0xff] }
  0xf8   : > { %3043 = vxpose.xlu0.b32.start.end [1/1] (short) (narrow) %v3042_v33, 16  ;;  %v2700_v36 = vsel %vm498_vm6, 1.0, %v3146_v23  ;;  %v357_v33 = vld [vmem:[%s3376_s17 + $0x28] sm:$0xff] }
  0xf9   : > { %v3054_v37 = vpack.i.bf16 %v2701_v35, %v2700_v36  ;;  %v2861_v38 = vpop.f32.mrb[6].mxu0  ;;  %v3316_v47 = vpop.f32.mrb[6].mxu1  ;;  %v359_v35 = vld [vmem:[%s3376_s17 + $0x38] sm:$0xff]  ;;  %v2442_v36 = vld [vmem:[%s3597_s5] sm:$0xff]  ;;  %s2755_s17 = sshll.u32 %s3216_s9, 7  ;;  %s3149_s9 = smov [#allocation2]  }
  0xfa   : > { %vm501_vm7 = vcmp.ge.f32.partialorder %v2861_v38, -2.1972246  ;;  %v485_v39 = vpop.f32.mrb[7].mxu0  ;;  %v3318_v48 = vpop.f32.mrb[7].mxu1  ;;  %v3148_v38 = vmov 0.0|0.0   ;;  %s3550_s22 = scalar_lea.hbm %s3599_s7, %s2755_s17  ;;  %s3086_s23 = sshll.u32 %s3149_s9, 4  ;;  %s3087_s23 = int_to_ptr.vmem [resolvable:$false] %s3086_s23 }
  0xfb   : > { %3055 = vxpose.xlu1.b32.start.end [1/1] (short) (narrow) %v3054_v37, 16  ;;  %v2703_v40 = vsel %vm501_vm7, 1.0, %v3146_v23  ;;  %vm500_vm8 = vcmp.ge.f32.partialorder %v485_v39, -2.1972246  ;;  %v2443_v37 = vld [vmem:[%s3597_s5 + $0x8] sm:$0xff]  ;;  %s3088_s26 = scalar_lea.vmem %s3087_s23, 256  ;;  %p3089_p0 = scmp.lt.s32.totalorder %s3552_s19, %s3087_s23 }
  0xfc   : > { %v2702_v41 = vsel %vm500_vm8, 1.0, %v3146_v23  ;;  %v2986_v39 = vpack.c.bf16 %v2443_v37, %v2442_v36  ;;  %p3090_p1 = scmp.lt.s32.totalorder %s3088_s26, %s3082_s25 }
  0xfd   : > { %v3066_v43 = vpack.i.bf16 %v2703_v40, %v2702_v41  ;;  %v3449_v40 = vld [vmem:[%s3593_s1 + $0x8] sm:$0x3] }
  0xfe   : > { %p3091_p2 = por %p3090_p1, %p3089_p0 }
 0x100   : > { %3067 = vxpose.xlu1.b32.start.end [1/1] (short) (narrow) %v3066_v43, 16  ;;  %p3092_p3 = pnand %p3091_p2, %p3085_p13 }
 0x173   : > { %v3032_v49 = vpop.trf.xlu0 }
 0x174   : > { %v3036_v50 = vunpack.i.h.bf16 %v3032_v49  ;;  %v3033_v51 = vunpack.i.l.bf16 %v3032_v49 }
 0x176   : > { %v2761_v52 = vpack.c.bf16 %v3036_v50, %v3036_v50  ;;  %v2759_v53 = vpack.c.bf16 %v3033_v51, %v3033_v51  ;;  %2884 = vmatprep.mubr.msk.f32.mxu0 %vm967_vm9, %v3033_v51  ;;  %2889 = vmatprep.mubr.msk.f32.mxu1 %vm967_vm9, %v3036_v50 }
 0x177   : > { %v3037_v54 = vpop.trf.xlu0 }
 0x178   : > { %842 = vst.msk [vmem:[%s3324_s10 + $0x8] sm:$0xf] %vm838_vm10, %v2761_v52  ;;  %839 = vst.msk [vmem:[%s3324_s10] sm:$0xf] %vm838_vm10, %v2759_v53  ;;  %v3041_v55 = vunpack.i.h.bf16 %v3037_v54  ;;  %v3038_v56 = vunpack.i.l.bf16 %v3037_v54 }
 0x17a   : > { %v2762_v57 = vpack.c.bf16 %v3041_v55, %v3041_v55  ;;  %v2760_v58 = vpack.c.bf16 %v3038_v56, %v3038_v56  ;;  %2885 = vmatmul.mubr.msk.f32.vlgmr.msra.gmra.mrb[8].mxu0 %vm967_vm9, %v3038_v56  ;;  %2890 = vmatmul.mubr.msk.f32.vlgmr.msra.gmra.mrb[8].mxu1 %vm967_vm9, %v3041_v55 }
 0x17b   : > { %v3044_v59 = vpop.trf.xlu0  ;;  %v3056_v60 = vpop.trf.xlu1  ;;  %2893 = vmatpush3.msra.mxu0 %v3308_v44  ;;  %2898 = vmatpush3.msra.mxu1 %v3306_v42 }
 0x17c   : > { %843 = vst.msk [vmem:[%s3324_s10 + $0xc] sm:$0x1] %vm840_vm11, %v2762_v57  ;;  %841 = vst.msk [vmem:[%s3324_s10 + $0x4] sm:$0x1] %vm840_vm11, %v2760_v58  ;;  %v3048_v61 = vunpack.i.h.bf16 %v3044_v59  ;;  %v3045_v62 = vunpack.i.l.bf16 %v3044_v59  ;;  %2902 = vmatprep.subr.mxu0 %v3314_v46  ;;  %2907 = vmatprep.subr.mxu1 %v3312_v45  ;;  %v3060_v63 = vunpack.i.h.bf16 %v3056_v60  ;;  %v3057_v0 = vunpack.i.l.bf16 %v3056_v60 }
 0x17e   : > { %v2765_v1 = vpack.c.bf16 %v3048_v61, %v3048_v61  ;;  %v2763_v2 = vpack.c.bf16 %v3045_v62, %v3045_v62  ;;  %2894 = vmatprep.mubr.msk.f32.mxu0 %vm967_vm9, %v3045_v62  ;;  %2899 = vmatprep.mubr.msk.f32.mxu1 %vm967_vm9, %v3048_v61  ;;  %v2769_v3 = vpack.c.bf16 %v3060_v63, %v3060_v63 }
 0x17f   : > { %v2767_v4 = vpack.c.bf16 %v3057_v0, %v3057_v0  ;;  %v3049_v5 = vpop.trf.xlu0  ;;  %v3061_v6 = vpop.trf.xlu1 }
 0x180   : > { %846 = vst.msk [vmem:[%s3324_s10 + $0x18] sm:$0xf] %vm838_vm10, %v2765_v1  ;;  %844 = vst.msk [vmem:[%s3324_s10 + $0x10] sm:$0xf] %vm838_vm10, %v2763_v2  ;;  %v3053_v7 = vunpack.i.h.bf16 %v3049_v5  ;;  %v3050_v8 = vunpack.i.l.bf16 %v3049_v5  ;;  %v3065_v9 = vunpack.i.h.bf16 %v3061_v6  ;;  %v3062_v10 = vunpack.i.l.bf16 %v3061_v6 }
 0x181   : > { %850 = vst.msk [vmem:[%s3324_s10 + $0x28] sm:$0xf] %vm838_vm10, %v2769_v3  ;;  %848 = vst.msk [vmem:[%s3324_s10 + $0x20] sm:$0xf] %vm838_vm10, %v2767_v4 }
 0x182   : > { %v2766_v11 = vpack.c.bf16 %v3053_v7, %v3053_v7  ;;  %v2764_v12 = vpack.c.bf16 %v3050_v8, %v3050_v8  ;;  %2895 = vmatmul.mubr.msk.f32.vlgmr.msra.gmra.mrb[10].mxu0 %vm967_vm9, %v3050_v8  ;;  %2900 = vmatmul.mubr.msk.f32.vlgmr.msra.gmra.mrb[10].mxu1 %vm967_vm9, %v3053_v7  ;;  %v2770_v13 = vpack.c.bf16 %v3065_v9, %v3065_v9 }
 0x183   : > { %v2768_v14 = vpack.c.bf16 %v3062_v10, %v3062_v10  ;;  %2903 = vmatpush3.msra.mxu0 %v3314_v46  ;;  %2908 = vmatpush3.msra.mxu1 %v3312_v45  ;;  %v3068_v15 = vpop.trf.xlu1 }
 0x184   : > { %847 = vst.msk [vmem:[%s3324_s10 + $0x1c] sm:$0x1] %vm840_vm11, %v2766_v11  ;;  %845 = vst.msk [vmem:[%s3324_s10 + $0x14] sm:$0x1] %vm840_vm11, %v2764_v12  ;;  %2904 = vmatprep.mubr.msk.f32.mxu0 %vm967_vm9, %v3057_v0  ;;  %2909 = vmatprep.mubr.msk.f32.mxu1 %vm967_vm9, %v3060_v63  ;;  %v3072_v16 = vunpack.i.h.bf16 %v3068_v15  ;;  %v3069_v17 = vunpack.i.l.bf16 %v3068_v15 }
 0x185   : > { %851 = vst.msk [vmem:[%s3324_s10 + $0x2c] sm:$0x1] %vm840_vm11, %v2770_v13  ;;  %849 = vst.msk [vmem:[%s3324_s10 + $0x24] sm:$0x1] %vm840_vm11, %v2768_v14  ;;  %2912 = vmatprep.subr.mxu0 %v3318_v48  ;;  %2917 = vmatprep.subr.mxu1 %v3316_v47 }
 0x186   : > { %v2773_v18 = vpack.c.bf16 %v3072_v16, %v3072_v16  ;;  %v2771_v19 = vpack.c.bf16 %v3069_v17, %v3069_v17  ;;  %2905 = vmatmul.mubr.msk.f32.vlgmr.msra.gmra.mrb[12].mxu0 %vm967_vm9, %v3062_v10  ;;  %2910 = vmatmul.mubr.msk.f32.vlgmr.msra.gmra.mrb[12].mxu1 %vm967_vm9, %v3065_v9 }
 0x187   : > { %2913 = vmatpush3.msra.mxu0 %v3318_v48  ;;  %2918 = vmatpush3.msra.mxu1 %v3316_v47  ;;  %v3073_v20 = vpop.trf.xlu1 }
 0x188   : > { %854 = vst.msk [vmem:[%s3324_s10 + $0x38] sm:$0xf] %vm838_vm10, %v2773_v18  ;;  %852 = vst.msk [vmem:[%s3324_s10 + $0x30] sm:$0xf] %vm838_vm10, %v2771_v19  ;;  %v3077_v21 = vunpack.i.h.bf16 %v3073_v20  ;;  %v3074_v24 = vunpack.i.l.bf16 %v3073_v20  ;;  %2914 = vmatprep.mubr.msk.f32.mxu0 %vm967_vm9, %v3069_v17  ;;  %2919 = vmatprep.mubr.msk.f32.mxu1 %vm967_vm9, %v3072_v16 }
 0x189   : > { %2922 = vmatprep.subr.mxu0 %v3146_v23  ;;  %2927 = vmatprep.subr.mxu1 %v3146_v23 }
 0x18a   : > { %v2774_v26 = vpack.c.bf16 %v3077_v21, %v3077_v21  ;;  %v2772_v27 = vpack.c.bf16 %v3074_v24, %v3074_v24  ;;  %2915 = vmatmul.mubr.msk.f32.vlgmr.msra.gmra.mrb[14].mxu0 %vm967_vm9, %v3074_v24  ;;  %2920 = vmatmul.mubr.msk.f32.vlgmr.msra.gmra.mrb[14].mxu1 %vm967_vm9, %v3077_v21 }
 0x18b   : > { %2923 = vmatpush3.msra.mxu0 %v3293_v25  ;;  %2928 = vmatpush3.msra.mxu1 %v3290_v22 }
 0x18c   : > { %855 = vst.msk [vmem:[%s3324_s10 + $0x3c] sm:$0x1] %vm840_vm11, %v2774_v26  ;;  %853 = vst.msk [vmem:[%s3324_s10 + $0x34] sm:$0x1] %vm840_vm11, %v2772_v27  ;;  %2924 = vmatprep.mubr.msk.f32.mxu0 %vm3147_vm12, %v3146_v23  ;;  %2929 = vmatprep.mubr.msk.f32.mxu1 %vm3147_vm12, %v3146_v23 }
 0x18d   : > { %2932 = vmatprep.subr.mxu0 %v3146_v23  ;;  %2937 = vmatprep.subr.mxu1 %v3146_v23 }
 0x18e   : > { %2925 = vmatmul.mubr.msk.f32.vlgmr.msra.gmra.mrb[16].mxu0 %vm967_vm9, %v352_v28  ;;  %2930 = vmatmul.mubr.msk.f32.vlgmr.msra.gmra.mrb[16].mxu1 %vm967_vm9, %v353_v29 }
 0x18f   : > { %2933 = vmatpush3.msra.mxu0 %v3308_v44  ;;  %2938 = vmatpush3.msra.mxu1 %v3306_v42 }
 0x190   : > { %2934 = vmatprep.mubr.msk.f32.mxu0 %vm3147_vm12, %v3146_v23  ;;  %2939 = vmatprep.mubr.msk.f32.mxu1 %vm3147_vm12, %v3146_v23 }
 0x191   : > { %2942 = vmatprep.subr.mxu0 %v3146_v23  ;;  %2947 = vmatprep.subr.mxu1 %v3146_v23 }
 0x192   : > { %2935 = vmatmul.mubr.msk.f32.vlgmr.msra.gmra.mrb[18].mxu0 %vm967_vm9, %v354_v30  ;;  %2940 = vmatmul.mubr.msk.f32.vlgmr.msra.gmra.mrb[18].mxu1 %vm967_vm9, %v355_v31 }
 0x193   : > { %2943 = vmatpush3.msra.mxu0 %v3314_v46  ;;  %2948 = vmatpush3.msra.mxu1 %v3312_v45 }
 0x194   : > { %2944 = vmatprep.mubr.msk.f32.mxu0 %vm3147_vm12, %v3146_v23  ;;  %2949 = vmatprep.mubr.msk.f32.mxu1 %vm3147_vm12, %v3146_v23 }
 0x195   : > { %2952 = vmatprep.subr.mxu0 %v3146_v23  ;;  %2957 = vmatprep.subr.mxu1 %v3146_v23 }
 0x196   : > { %2945 = vmatmul.mubr.msk.f32.vlgmr.msra.gmra.mrb[20].mxu0 %vm967_vm9, %v356_v32  ;;  %2950 = vmatmul.mubr.msk.f32.vlgmr.msra.gmra.mrb[20].mxu1 %vm967_vm9, %v357_v33 }
 0x197   : > { %2953 = vmatpush3.msra.mxu0 %v3318_v48  ;;  %2958 = vmatpush3.msra.mxu1 %v3316_v47 }
 0x198   : > { %2954 = vmatprep.mubr.msk.f32.mxu0 %vm3147_vm12, %v3146_v23  ;;  %2959 = vmatprep.mubr.msk.f32.mxu1 %vm3147_vm12, %v3146_v23 }
 0x199   : > { %2985 = vmatprep.subr.bf16.mxu0 %v3148_v38 }
 0x19a   : > { %2955 = vmatmul.mubr.msk.f32.vlgmr.msra.gmra.mrb[22].mxu0 %vm967_vm9, %v358_v34  ;;  %2960 = vmatmul.mubr.msk.f32.vlgmr.msra.gmra.mrb[22].mxu1 %vm967_vm9, %v359_v35 }
 0x19b   : > { %2966 = vmatprep.mubr.msk.f32.mxu0 %vm3147_vm12, %v3146_v23  ;;  %2987 = vmatpush3.bf16.msra.mxu0 %v2986_v39  ;;  %v3454_v23 = vld [vmem:[%s3593_s1] sm:$0xff] }
 0x24d   : > { %v2886_v41 = vpop.f32.mrb[8].mxu0  ;;  %v2891_v43 = vpop.f32.mrb[8].mxu1 }
 0x24e   : > { %v1617_v49 = vadd.f32 %v2886_v41, %v3449_v40  ;;  %v1619_v50 = vadd.f32 %v2891_v43, %v3449_v40  ;;  %v1040_v51 = vpop.f32.mrb[9].mxu0  ;;  %v1121_v52 = vpop.f32.mrb[9].mxu1 }
 0x24f   : > { %v1616_v53 = vadd.f32 %v1040_v51, %v3454_v23  ;;  %v1618_v54 = vadd.f32 %v1121_v52, %v3454_v23 }
 0x250   : > { %vm2225_vm15 = vcmp.gt.f32.partialorder %v1617_v49, 0.0  ;;  %v2241_v55 = vmul.f32 0.01, %v1617_v49  ;;  %vm2227_vm0 = vcmp.gt.f32.partialorder %v1619_v50, 0.0  ;;  %v2243_v56 = vmul.f32 0.01, %v1619_v50 }
 0x251   : > { %vm2224_vm1 = vcmp.gt.f32.partialorder %v1616_v53, 0.0  ;;  %v2240_v57 = vmul.f32 0.01, %v1616_v53  ;;  %vm2226_vm2 = vcmp.gt.f32.partialorder %v1618_v54, 0.0  ;;  %v2242_v58 = vmul.f32 0.01, %v1618_v54 }
 0x252   : > { %v2257_v59 = vsel %vm2225_vm15, %v1617_v49, %v2241_v55  ;;  %v2259_v60 = vsel %vm2227_vm0, %v1619_v50, %v2243_v56 }
 0x253   : > { %v2299_v61 = vsel %vm2298_vm13, %v2257_v59, 0.0  ;;  %v2308_v62 = vsel %vm2298_vm13, %v2259_v60, 0.0  ;;  %v2256_v63 = vsel %vm2224_vm1, %v1616_v53, %v2240_v57  ;;  %v2258_v0 = vsel %vm2226_vm2, %v1618_v54, %v2242_v58 }
 0x254   : > { %v2297_v1 = vsel %vm2296_vm14, %v2256_v63, 0.0  ;;  %v2307_v2 = vsel %vm2296_vm14, %v2258_v0, 0.0 }
 0x255   : > { %v2300_v3 = vadd.f32 %v2299_v61, %v2297_v1  ;;  %v2309_v4 = vadd.f32 %v2308_v62, %v2307_v2  ;;  %v2896_v5 = vpop.f32.mrb[10].mxu0  ;;  %v2901_v6 = vpop.f32.mrb[10].mxu1 }
 0x256   : > { %v1621_v7 = vadd.f32 %v2896_v5, %v3449_v40  ;;  %v1623_v8 = vadd.f32 %v2901_v6, %v3449_v40  ;;  %v1202_v9 = vpop.f32.mrb[11].mxu0  ;;  %v1283_v10 = vpop.f32.mrb[11].mxu1 }
 0x257   : > { %v2301_v11 = vrot.slane %v2300_v3, 4  ;;  %v2310_v12 = vrot.slane %v2309_v4, 4  ;;  %v1620_v13 = vadd.f32 %v1202_v9, %v3454_v23  ;;  %v1622_v14 = vadd.f32 %v1283_v10, %v3454_v23 }
 0x258   : > { %vm2229_vm3 = vcmp.gt.f32.partialorder %v1621_v7, 0.0  ;;  %v2245_v15 = vmul.f32 0.01, %v1621_v7  ;;  %vm2231_vm4 = vcmp.gt.f32.partialorder %v1623_v8, 0.0  ;;  %v2247_v16 = vmul.f32 0.01, %v1623_v8 }
 0x259   : > { %v2302_v17 = vadd.f32 %v2301_v11, %v2300_v3  ;;  %v2311_v18 = vadd.f32 %v2310_v12, %v2309_v4  ;;  %vm2228_vm5 = vcmp.gt.f32.partialorder %v1620_v13, 0.0  ;;  %v2244_v19 = vmul.f32 0.01, %v1620_v13  ;;  %v2906_v20 = vpop.f32.mrb[12].mxu0  ;;  %v2911_v21 = vpop.f32.mrb[12].mxu1 }
 0x25a   : > { %v2261_v24 = vsel %vm2229_vm3, %v1621_v7, %v2245_v15  ;;  %v2263_v26 = vsel %vm2231_vm4, %v1623_v8, %v2247_v16  ;;  %vm2230_vm6 = vcmp.gt.f32.partialorder %v1622_v14, 0.0  ;;  %v2246_v27 = vmul.f32 0.01, %v1622_v14  ;;  %v1364_v28 = vpop.f32.mrb[13].mxu0  ;;  %v1445_v29 = vpop.f32.mrb[13].mxu1 }
 0x25b   : > { %v2317_v30 = vsel %vm2298_vm13, %v2261_v24, 0.0  ;;  %v2326_v31 = vsel %vm2298_vm13, %v2263_v26, 0.0  ;;  %v2260_v32 = vsel %vm2228_vm5, %v1620_v13, %v2244_v19  ;;  %v1625_v34 = vadd.f32 %v2906_v20, %v3449_v40 }
 0x25c   : > { %v2262_v33 = vsel %vm2230_vm6, %v1622_v14, %v2246_v27  ;;  %v1627_v35 = vadd.f32 %v2911_v21, %v3449_v40  ;;  %v2303_v36 = vrot.slane %v2302_v17, 2  ;;  %v2312_v37 = vrot.slane %v2311_v18, 2 }
 0x25d   : > { %v2316_v38 = vsel %vm2296_vm14, %v2260_v32, 0.0  ;;  %v2325_v39 = vsel %vm2296_vm14, %v2262_v33, 0.0  ;;  %v2916_v41 = vpop.f32.mrb[14].mxu0  ;;  %v2921_v43 = vpop.f32.mrb[14].mxu1  ;;  %vm2233_vm7 = vcmp.gt.f32.partialorder %v1625_v34, 0.0  ;;  %v1624_v57 = vadd.f32 %v1364_v28, %v3454_v23 }
 0x25e   : > { %v2318_v49 = vadd.f32 %v2317_v30, %v2316_v38  ;;  %v2327_v50 = vadd.f32 %v2326_v31, %v2325_v39  ;;  %v2249_v51 = vmul.f32 0.01, %v1625_v34  ;;  %v1526_v52 = vpop.f32.mrb[15].mxu0  ;;  %v1607_v53 = vpop.f32.mrb[15].mxu1  ;;  %vm2235_vm8 = vcmp.gt.f32.partialorder %v1627_v35, 0.0 }
 0x25f   : > { %v2251_v54 = vmul.f32 0.01, %v1627_v35  ;;  %v3475_v58 = vadd.f32 %v2303_v36, %v2302_v17  ;;  %v3477_v63 = vadd.f32 %v2312_v37, %v2311_v18  ;;  %vm2232_vm9 = vcmp.gt.f32.partialorder %v1624_v57, 0.0 }
 0x260   : > { %v2319_v55 = vrot.slane %v2318_v49, 4  ;;  %v2328_v56 = vrot.slane %v2327_v50, 4  ;;  %v2265_v59 = vsel %vm2233_vm7, %v1625_v34, %v2249_v51  ;;  %v2248_v4 = vmul.f32 0.01, %v1624_v57 }
 0x261   : > { %v2267_v60 = vsel %vm2235_vm8, %v1627_v35, %v2251_v54  ;;  %v1701_v61 = vpop.f32.mrb[16].mxu0  ;;  %v1774_v62 = vpop.f32.mrb[16].mxu1  ;;  %v1626_v5 = vadd.f32 %v1445_v29, %v3454_v23  ;;  %v1629_v6 = vadd.f32 %v2916_v41, %v3449_v40  ;;  %v1631_v7 = vadd.f32 %v2921_v43, %v3449_v40 }
 0x262   : > { %v2320_v0 = vadd.f32 %v2319_v55, %v2318_v49  ;;  %v2329_v1 = vadd.f32 %v2328_v56, %v2327_v50  ;;  %v2926_v2 = vpop.f32.mrb[17].mxu0  ;;  %v2931_v3 = vpop.f32.mrb[17].mxu1  ;;  %v2335_v10 = vsel %vm2298_vm13, %v2265_v59, 0.0  ;;  %v2344_v11 = vsel %vm2298_vm13, %v2267_v60, 0.0 }
 0x263   : > { %v2264_v12 = vsel %vm2232_vm9, %v1624_v57, %v2248_v4  ;;  %vm2234_vm10 = vcmp.gt.f32.partialorder %v1626_v5, 0.0  ;;  %v2250_v13 = vmul.f32 0.01, %v1626_v5  ;;  %vm2237_vm11 = vcmp.gt.f32.partialorder %v1629_v6, 0.0 }
 0x264   : > { %v2321_v8 = vrot.slane %v2320_v0, 2  ;;  %v2330_v9 = vrot.slane %v2329_v1, 2  ;;  %v2334_v16 = vsel %vm2296_vm14, %v2264_v12, 0.0  ;;  %v2253_v17 = vmul.f32 0.01, %v1629_v6 }
 0x265   : > { %v1847_v14 = vpop.f32.mrb[18].mxu0  ;;  %v1920_v15 = vpop.f32.mrb[18].mxu1  ;;  %v1628_v18 = vadd.f32 %v1526_v52, %v3454_v23  ;;  %v1630_v19 = vadd.f32 %v1607_v53, %v3454_v23  ;;  %v2336_v21 = vadd.f32 %v2335_v10, %v2334_v16  ;;  %v2266_v24 = vsel %vm2234_vm10, %v1626_v5, %v2250_v13 }
 0x266   : > { %v2936_v40 = vpop.f32.mrb[19].mxu0  ;;  %v2941_v20 = vpop.f32.mrb[19].mxu1  ;;  %vm2239_vm12 = vcmp.gt.f32.partialorder %v1631_v7, 0.0  ;;  %v2255_v26 = vmul.f32 0.01, %v1631_v7  ;;  %v2305_v27 = vrot.slane %v3475_v58, 1  ;;  %v2269_v30 = vsel %vm2237_vm11, %v1629_v6, %v2253_v17 }
 0x267   : > { %v2314_v28 = vrot.slane %v3477_v63, 1  ;;  %v2343_v29 = vsel %vm2296_vm14, %v2266_v24, 0.0  ;;  %v2322_v31 = vadd.f32 %v2321_v8, %v2320_v0  ;;  %v2337_v32 = vrot.slane %v2336_v21, 4 }
 0x268   : > { %v2345_v33 = vadd.f32 %v2344_v11, %v2343_v29  ;;  %v2271_v34 = vsel %vm2239_vm12, %v1631_v7, %v2255_v26  ;;  %v2331_v36 = vadd.f32 %v2330_v9, %v2329_v1  ;;  %v2353_v37 = vsel %vm2298_vm13, %v2269_v30, 0.0 }
 0x269   : > { %v1993_v35 = vpop.f32.mrb[20].mxu0  ;;  %v3491_v23 = vpop.f32.mrb[20].mxu1  ;;  %v2362_v38 = vsel %vm2298_vm13, %v2271_v34, 0.0  ;;  %vm2236_vm15 = vcmp.gt.f32.partialorder %v1628_v18, 0.0  ;;  %v2338_v43 = vadd.f32 %v2337_v32, %v2336_v21  ;;  %v2252_v50 = vmul.f32 0.01, %v1628_v18 }
 0x26a   : > { %v2946_v39 = vpop.f32.mrb[21].mxu0  ;;  %v2951_v41 = vpop.f32.mrb[21].mxu1  ;;  %v2346_v49 = vrot.slane %v2345_v33, 4  ;;  %vm2238_vm0 = vcmp.gt.f32.partialorder %v1630_v19, 0.0  ;;  %v2254_v51 = vmul.f32 0.01, %v1630_v19  ;;  %v2216_v52 = vadd.f32 %v1701_v61, %v3293_v25 }
 0x26b   : > { %v2217_v53 = vadd.f32 %v3290_v22, %v1774_v62  ;;  %v2218_v54 = vadd.f32 %v1847_v14, %v3308_v44  ;;  %v2339_v55 = vrot.slane %v2338_v43, 2  ;;  %v2268_v57 = vsel %vm2236_vm15, %v1628_v18, %v2252_v50 }
 0x26c   : > { %v2347_v56 = vadd.f32 %v2346_v49, %v2345_v33  ;;  %v2219_v59 = vadd.f32 %v3306_v42, %v1920_v15  ;;  %v2352_v1 = vsel %vm2296_vm14, %v2268_v57, 0.0  ;;  %v2270_v2 = vsel %vm2238_vm0, %v1630_v19, %v2254_v51 }
 0x26d   : > { %v3499_v60 = vpop.f32.mrb[22].mxu0  ;;  %v3501_v0 = vpop.f32.mrb[22].mxu1  ;;  %vm2272_vm13 = vcmp.gt.f32.partialorder %v2216_v52, 0.0  ;;  %v2280_v3 = vmul.f32 0.01, %v2216_v52  ;;  %v2323_v61 = vrot.slane %v2322_v31, 1  ;;  %v2340_v22 = vadd.f32 %v2339_v55, %v2338_v43 }
 0x26e   : > { %v2956_v4 = vpop.f32.mrb[23].mxu0  ;;  %v2961_v25 = vpop.f32.mrb[23].mxu1  ;;  %v2354_v62 = vadd.f32 %v2353_v37, %v2352_v1  ;;  %v2361_v44 = vsel %vm2296_vm14, %v2270_v2, 0.0  ;;  %vm2273_vm1 = vcmp.gt.f32.partialorder %v2217_v53, 0.0  ;;  %v2281_v42 = vmul.f32 0.01, %v2217_v53 }
 0x26f   : > { %v2363_v5 = vadd.f32 %v2362_v38, %v2361_v44  ;;  %v2288_v6 = vsel %vm2272_vm13, %v2216_v52, %v2280_v3  ;;  %v2332_v7 = vrot.slane %v2331_v36, 1  ;;  %v2348_v8 = vrot.slane %v2347_v56, 2 }
 0x270   : > { %v2370_v9 = vsel %vm2296_vm14, %v2288_v6, 0.0  ;;  %v2306_v10 = vadd.f32 %v2305_v27, %v3475_v58  ;;  %v2289_v12 = vsel %vm2273_vm1, %v2217_v53, %v2281_v42  ;;  %v2315_v13 = vadd.f32 %v2314_v28, %v3477_v63 }
 0x271   : > { %v2371_v11 = vrot.slane %v2370_v9, 4  ;;  %v3508_v14 = vadd.f32 %v2323_v61, %v2322_v31  ;;  %v2377_v15 = vsel %vm2296_vm14, %v2289_v12, 0.0  ;;  %vm2274_vm2 = vcmp.gt.f32.partialorder %v2218_v54, 0.0 }
 0x272   : > { %v2341_v16 = vrot.slane %v2340_v22, 1  ;;  %v2378_v18 = vrot.slane %v2377_v15, 4  ;;  %v2282_v19 = vmul.f32 0.01, %v2218_v54  ;;  %v3511_v40 = vadd.f32 %v2332_v7, %v2331_v36 }
 0x273   : > { %v2372_v17 = vadd.f32 %v2371_v11, %v2370_v9  ;;  %v3513_v20 = vadd.f32 %v2348_v8, %v2347_v56  ;;  %vm2275_vm3 = vcmp.gt.f32.partialorder %v2219_v59, 0.0  ;;  %v2283_v21 = vmul.f32 0.01, %v2219_v59 }
 0x274   : > { %v2355_v58 = vrot.slane %v2354_v62, 4  ;;  %v2379_v26 = vadd.f32 %v2378_v18, %v2377_v15  ;;  %v2290_v27 = vsel %vm2274_vm2, %v2218_v54, %v2282_v19  ;;  %v2364_v63 = vrot.slane %v2363_v5, 4 }
 0x275   : > { %v2373_v24 = vrot.slane %v2372_v17, 2  ;;  %v2384_v28 = vsel %vm2296_vm14, %v2290_v27, 0.0  ;;  %v2291_v29 = vsel %vm2275_vm3, %v2219_v59, %v2283_v21  ;;  %v2220_v30 = vadd.f32 %v1993_v35, %v3314_v46 }
 0x276   : > { %v3517_v31 = vadd.f32 %v2341_v16, %v2340_v22  ;;  %v2380_v33 = vrot.slane %v2379_v26, 2  ;;  %v2385_v34 = vrot.slane %v2384_v28, 4  ;;  %v2350_v36 = vrot.slane %v3513_v20, 1 }
 0x277   : > { %v2374_v32 = vadd.f32 %v2373_v24, %v2372_v17  ;;  %vm2459_vm4 = vcmask 1041409   ;;  %v2391_v37 = vsel %vm2296_vm14, %v2291_v29, 0.0  ;;  %vm2276_vm5 = vcmp.gt.f32.partialorder %v2220_v30, 0.0 }
 0x278   : > { %v2284_v38 = vmul.f32 0.01, %v2220_v30  ;;  %v2356_v39 = vadd.f32 %v2355_v58, %v2354_v62  ;;  %v2381_v43 = vadd.f32 %v2380_v33, %v2379_v26  ;;  %v2386_v49 = vadd.f32 %v2385_v34, %v2384_v28 }
 0x279   : > { %v2375_v41 = vrot.slane %v2374_v32, 1  ;;  %v2365_v50 = vadd.f32 %v2364_v63, %v2363_v5  ;;  %v2392_v51 = vrot.slane %v2391_v37, 4  ;;  %v2221_v46 = vadd.f32 %v3312_v45, %v3491_v23 }
 0x27a   : > { %v2292_v52 = vsel %vm2276_vm5, %v2220_v30, %v2284_v38  ;;  %v2382_v53 = vrot.slane %v2381_v43, 1  ;;  %v2387_v54 = vrot.slane %v2386_v49, 2  ;;  %vm2461_vm7 = vcmask 1042434  }
 0x27b   : > { %v2376_v35 = vadd.f32 %v2375_v41, %v2374_v32  ;;  %v2398_v55 = vsel %vm2296_vm14, %v2292_v52, 0.0  ;;  %v2393_v56 = vadd.f32 %v2392_v51, %v2391_v37  ;;  %vm2277_vm6 = vcmp.gt.f32.partialorder %v2221_v46, 0.0 }
 0x27c   : > { %v2399_v57 = vrot.slane %v2398_v55, 4  ;;  %v2285_v59 = vmul.f32 0.01, %v2221_v46  ;;  %v2383_v2 = vadd.f32 %v2382_v53, %v2381_v43  ;;  %v2388_v3 = vadd.f32 %v2387_v54, %v2386_v49 }
 0x27d   : > { %v2426_v1 = vadd.f32 %v2376_v35, %v2306_v10  ;;  %v2222_v4 = vadd.f32 %v3499_v60, %v3318_v48  ;;  %v2394_v25 = vrot.slane %v2393_v56, 2  ;;  %v2223_v45 = vadd.f32 %v3316_v47, %v3501_v0 }
 0x27e   : > { %v2400_v61 = vadd.f32 %v2399_v57, %v2398_v55  ;;  %v2293_v22 = vsel %vm2277_vm6, %v2221_v46, %v2285_v59  ;;  %v2427_v62 = vadd.f32 %v2383_v2, %v2315_v13  ;;  %v2389_v44 = vrot.slane %v2388_v3, 1 }
 0x27f   : > { %v2434_v23 = vmul.f32 0.055555556, %v2426_v1  ;;  %v2405_v5 = vsel %vm2296_vm14, %v2293_v22, 0.0  ;;  %vm2463_vm8 = vcmask 1043459   ;;  %v2395_v6 = vadd.f32 %v2394_v25, %v2393_v56 }
 0x280   : > { %v2401_v42 = vrot.slane %v2400_v61, 2  ;;  %v2406_v7 = vrot.slane %v2405_v5, 4  ;;  %vm2278_vm9 = vcmp.gt.f32.partialorder %v2222_v4, 0.0  ;;  %v2435_v8 = vmul.f32 0.055555556, %v2427_v62 }
 0x281   : > { %v2390_v9 = vadd.f32 %v2389_v44, %v2388_v3  ;;  %v2286_v10 = vmul.f32 0.01, %v2222_v4  ;;  %vm2279_vm10 = vcmp.gt.f32.partialorder %v2223_v45, 0.0  ;;  %v2396_v48 = vrot.slane %v2395_v6, 1  ;;  %v2752_v62 = vld [vmem:[%s3598_s6] ss:$0 sm:$0xff] }
 0x282   : > { %v2402_v60 = vadd.f32 %v2401_v42, %v2400_v61  ;;  %v2407_v11 = vadd.f32 %v2406_v7, %v2405_v5  ;;  %v2287_v12 = vmul.f32 0.01, %v2223_v45  ;;  %v2357_v15 = vrot.slane %v2356_v39, 2 }
 0x283   : > { %v2460_v47 = vsel %vm2459_vm4, %v2435_v8, %v2434_v23  ;;  %v2428_v0 = vadd.f32 %v2390_v9, %v3508_v14  ;;  %v2294_v13 = vsel %vm2278_vm9, %v2222_v4, %v2286_v10  ;;  %v2397_v16 = vadd.f32 %v2396_v48, %v2395_v6 }
 0x284   : > { %v2403_v17 = vrot.slane %v2402_v60, 1  ;;  %v2408_v18 = vrot.slane %v2407_v11, 2  ;;  %v2412_v19 = vsel %vm2296_vm14, %v2294_v13, 0.0  ;;  %v2366_v21 = vrot.slane %v2365_v50, 2 }
 0x285   : > { %v2436_v58 = vmul.f32 0.055555556, %v2428_v0  ;;  %v2413_v24 = vrot.slane %v2412_v19, 4  ;;  %v2295_v26 = vsel %vm2279_vm10, %v2223_v45, %v2287_v12  ;;  %v2429_v27 = vadd.f32 %v2397_v16, %v3511_v40 }
 0x286   : > { %v2404_v63 = vadd.f32 %v2403_v17, %v2402_v60  ;;  %v2409_v28 = vadd.f32 %v2408_v18, %v2407_v11  ;;  %v2419_v29 = vsel %vm2296_vm14, %v2295_v26, 0.0  ;;  %v2358_v30 = vadd.f32 %v2357_v15, %v2356_v39 }
 0x287   : > { %v2414_v32 = vadd.f32 %v2413_v24, %v2412_v19  ;;  %v2420_v14 = vrot.slane %v2419_v29, 4  ;;  %v2462_v33 = vsel %vm2461_vm7, %v2436_v58, %v2460_v47  ;;  %v2437_v34 = vmul.f32 0.055555556, %v2429_v27 }
 0x288   : > { %v2430_v37 = vadd.f32 %v2404_v63, %v3517_v31  ;;  %v2410_v38 = vrot.slane %v2409_v28, 1  ;;  %v2367_v41 = vadd.f32 %v2366_v21, %v2365_v50  ;;  %vm2465_vm11 = vcmask 1044484  }
 0x289   : > { %v2415_v43 = vrot.slane %v2414_v32, 2  ;;  %v2421_v49 = vadd.f32 %v2420_v14, %v2419_v29  ;;  %v2351_v40 = vadd.f32 %v2350_v36, %v3513_v20  ;;  %v2464_v39 = vsel %vm2463_vm8, %v2437_v34, %v2462_v33 }
 0x28a   : > { %v2438_v51 = vmul.f32 0.055555556, %v2430_v37  ;;  %v2411_v52 = vadd.f32 %v2410_v38, %v2409_v28  ;;  %v2359_v46 = vrot.slane %v2358_v30, 1  ;;  %v2368_v56 = vrot.slane %v2367_v41, 1 }
 0x28b   : > { %v2416_v35 = vadd.f32 %v2415_v43, %v2414_v32  ;;  %v2422_v53 = vrot.slane %v2421_v49, 2  ;;  %vm2467_vm12 = vcmask 1045509   ;;  %vm2469_vm15 = vcmask 1046534  }
 0x28c   : > { %v2431_v54 = vadd.f32 %v2411_v52, %v2351_v40  ;;  %v2466_v55 = vsel %vm2465_vm11, %v2438_v51, %v2464_v39  ;;  %v2360_v59 = vadd.f32 %v2359_v46, %v2358_v30  ;;  %v2369_v20 = vadd.f32 %v2368_v56, %v2367_v41 }
 0x28d   : > { %v2417_v31 = vrot.slane %v2416_v35, 1  ;;  %v2423_v57 = vadd.f32 %v2422_v53, %v2421_v49  ;;  %vm2471_vm0 = vcmask 1047559  }
 0x28e   : > { %v2439_v50 = vmul.f32 0.055555556, %v2431_v54 }
 0x28f   : > { %v2418_v1 = vadd.f32 %v2417_v31, %v2416_v35  ;;  %v2424_v2 = vrot.slane %v2423_v57, 1 }
 0x290   : > { %v2468_v3 = vsel %vm2467_vm12, %v2439_v50, %v2466_v55 }
 0x291   : > { %v2425_v4 = vadd.f32 %v2424_v2, %v2423_v57  ;;  %v2432_v36 = vadd.f32 %v2418_v1, %v2360_v59 }
 0x293   : > { %v2433_v25 = vadd.f32 %v2425_v4, %v2369_v20  ;;  %v2440_v61 = vmul.f32 0.055555556, %v2432_v36 }
 0x295   : > { %v2441_v22 = vmul.f32 0.055555556, %v2433_v25  ;;  %v2470_v45 = vsel %vm2469_vm15, %v2440_v61, %v2468_v3 }
 0x297   : > { %v2472_v23 = vsel %vm2471_vm0, %v2441_v22, %v2470_v45 }
 0x298   : > { %2967 = vmatmul.mubr.msk.f32.vlgmr.msra.gmra.mrb[24].mxu0 %vm2296_vm14, %v2472_v23 }
 0x36b   : > { %v2541_v44 = vpop.f32.mrb[24].mxu0 }
 0x36c   : > { %v2542_v5 = vadd.f32 %v2752_v62, %v2541_v44  ;;  %v2968_v6 = vpop.f32.mrb[25].mxu0 }
 0x36e   : > { %2545 = vmax.xlane.f32.xlu0 %v2542_v5 }
 0x3fb   : > { %v2546_v42 = vpop.xlane.xlu0 %2545 }
 0x3fc   : > { %v2547_v7 = vsub.f32 %v2542_v5, %v2546_v42 }
 0x3fe   : > { %v2548_v8 = vmul.f32 1.442695, %v2547_v7 }
 0x400   : > { %3078 = vpow2.f32 %v2548_v8 }
 0x40a   : > { %v3079_v9 = vpop.eup %3078 }
 0x40b   : > { %2550 = vadd.xlane.f32.xlu1 %v3079_v9 }
 0x498   : > { %v2551_v10 = vpop.xlane.xlu1 %2550 }
 0x499   : > { %3080 = vrcp.f32 %v2551_v10 }
 0x4a3   : > { %v3081_v48 = vpop.eup %3080 }
 0x4a4   : > { %v2553_v60 = vmul.f32 %v3081_v48, %v3079_v9 }
 0x4a6   : > { %2554 = vst [vmem:[%s316_s18] sm:$0xff] %v2553_v60 }
 0x4a7   : > { %3095 = shalt.err (!%p3092_p3)
}
 0x4a8   : > { %s3096_s10 = scalar_lea.hbm %s3550_s22, 128  ;;  %s3100_s17 = scalar_lea.hbm %s3599_s7, 256 }
 0x4a9   : > { %p3097_p4 = scmp.ne.s32.totalorder %s3550_s22, %s3096_s10  ;;  %p3101_p9 = scmp.lt.u32.totalorder %s3550_s22, %s3599_s7 }
 0x4aa   : > { %p3102_p10 = scmp.lt.u32.totalorder %s3100_s17, %s3096_s10  ;;  %p3104_p12 = scmp.lt.u32.totalorder %s3096_s10, %s3550_s22 }
 0x4ab   : > { %p3098_p7 = pnand %p3097_p4, %p3233_p5 }
 0x4ac   : > { %p3103_p11 = por %p3102_p10, %p3101_p9 }
 0x4ad   : > { %p3099_p8 = pneg %p3098_p7 }
 0x4ae   : > { %p3105_p13 = por %p3104_p12, %p3103_p11 }
 0x4b0   : > { %p3106_p0 = pnand %p3105_p13, %p3099_p8 }
 0x4b2   : > { %3109 = shalt.err (!%p3106_p0)
}
 0x4b3   : > { %2988 = dma.vmem_to_hbm [thread:$0]  (%p3233_p5), %s3552_s19, 128, %s3550_s22, %s2556_s24  }
 0x4b4 PF: > { %p2994_p1 = scmp.ge.s32.totalorder %s3144_s30, 2  ;;  %s2591_s21 = sand.u32 1, %s3132_s27  }
 0x4b5   : > { %s2592_s25 = scalar_lea.sflag [#allocation3], %s2591_s21 }
 0x4b6   : > { %p2991_p2 = pnand %p2994_p1, %p3237_p6 }
 0x4b8   : > { %3127 = dma.done.wait (!%p2991_p2), %s2592_s25, 128  }
 0x4b9   : > { %3129 = vsyncadd (!%p2991_p2), %s2592_s25, 4294967168  ;;  %p19_p3 = scmp.ge.s32.totalorder %s3220_s11, 4   ;;  %s3603_s27 = smov %s3136_s28 }
 0x4ba   : > { %s3604_s28 = smov %s3140_s29  ;;  %s3605_s29 = smov %s3231_s14 }
 0x4bb   : > { %s3606_s30 = smov %s3220_s11  ;;  %21 = sbr.rel (!%p19_p3) target bundleno = 3 (0x3), region = 98 }
 0x4c2   :  { %2606 = vsyncpa [#allocation3], 1 }
 0x4c3   :  { %2608 = vsyncpa [#allocation3 + $0x1], 1 }

</bundles_post_ra>
